<compile_context>
chip_gen: v5e
topology: v5e:2x2
jax: 0.10.0
libtpu: 0.0.40
codegen_flags: <defaults>
</compile_context>

<pallas_src>
import jax
import jax.numpy as jnp
from jax import lax
from jax.experimental import pallas as pl
from jax.experimental.pallas import tpu as pltpu


def binding_kernel(pos_ref, ts_ref, wp_ref, wt_ref, wl_ref, b_ref, out_ref):
    # NT matmuls: contract the activation feature dim with the weights' [out, in]
    # "in" dim.  MXU with f32 accumulation.
    dn = (((1,), (1,)), ((), ()))
    pc = lax.dot_general(pos_ref[...], wp_ref[...], dn,
                         preferred_element_type=jnp.float32)        # [bt, L]
    tc = lax.dot_general(ts_ref[...], wt_ref[...], dn,
                         preferred_element_type=jnp.float32)        # [bt, L]
    bc = pc * tc                                                    # binding_mode='mul' (VPU, f32)
    proj = lax.dot_general(bc, wl_ref[...], dn,
                           preferred_element_type=jnp.float32)      # [bt, O]
    proj = proj + b_ref[...]                                        # bias broadcast [1, O]
    out_ref[...] = jnp.maximum(proj, 0.0).astype(out_ref.dtype)     # ReLU


def _num_batch_tiles():
    """2 grid steps on dual-TensorCore chips (v7x / v4 / v5p), else 1 (v5e/v6e)."""
    try:
        kind = jax.devices()[0].device_kind.lower()
    except Exception:
        return 1
    if any(tag in kind for tag in ("v7", "7x", "v4", "v5p")):
        return 2
    return 1


def _pick_b_tile(B, num_tiles):
    """Largest even split into `num_tiles` lane/sublane-friendly tiles, else the full batch."""
    if num_tiles <= 1 or B % 128 != 0:
        return B
    bt = ((pl.cdiv(B, num_tiles) + 127) // 128) * 128
    if bt >= B or B % bt != 0:
        return B
    return bt


def binding_model_forward(position, timestamp, wp, wt, wl, bias, *, b_tile=None):
    """position: [B, P], timestamp: [B, T]
       wp: [L, P], wt: [L, T], wl: [O, L], bias: [O]  (PyTorch nn.Linear layout)."""
    B, P = position.shape
    _, T = timestamp.shape
    L, _ = wp.shape
    O, _ = wl.shape
    out_dtype = position.dtype

    if b_tile is None:
        b_tile = _pick_b_tile(B, _num_batch_tiles())
    grid = (B // b_tile,)

    bias2d = bias.reshape(1, O)   # 2-D so it sits as a lane vector in VMEM

    itemsize = jnp.dtype(position.dtype).itemsize
    cost = pl.CostEstimate(
        flops=2 * B * L * (P + T) + 2 * B * L * O,
        transcendentals=0,
        bytes_accessed=(B * (P + T) + L * (P + T) + O * L + O + B * O) * itemsize,
    )

    return pl.pallas_call(
        binding_kernel,
        out_shape=jax.ShapeDtypeStruct((B, O), out_dtype),
        grid=grid,
        in_specs=[
            pl.BlockSpec((b_tile, P), lambda i: (i, 0)),   # position tile over batch
            pl.BlockSpec((b_tile, T), lambda i: (i, 0)),   # timestamp tile over batch
            pl.BlockSpec((L, P), lambda i: (0, 0)),        # Wp  (VMEM-resident)
            pl.BlockSpec((L, T), lambda i: (0, 0)),        # Wt  (VMEM-resident)
            pl.BlockSpec((O, L), lambda i: (0, 0)),        # Wl  (VMEM-resident)
            pl.BlockSpec((1, O), lambda i: (0, 0)),        # bias (VMEM-resident)
        ],
        out_specs=pl.BlockSpec((b_tile, O), lambda i: (i, 0)),
        compiler_params=pltpu.CompilerParams(
            dimension_semantics=("parallel",)),
        cost_estimate=cost,
    )(position, timestamp, wp, wt, wl, bias2d)


def reference_forward(position, timestamp, wp, wt, wl, bias):
    """Pure-JAX f32 reference mirroring the PyTorch forward."""
    pc = jnp.dot(position, wp.T, preferred_element_type=jnp.float32)
    tc = jnp.dot(timestamp, wt.T, preferred_element_type=jnp.float32)
    bc = pc * tc
    proj = jnp.dot(bc, wl.T, preferred_element_type=jnp.float32) + bias
    return jnp.maximum(proj, 0.0).astype(position.dtype)


if __name__ == "__main__":
    # Shapes consistent with the module: position_size=16, timestamp_size=8,
    # latent_size=32, output_size=16.  batch=256 -> 1 grid step on v5e/v6e,
    # 2 parallel steps of 128 on dual-TensorCore chips.
    B, P, T, L, O = 256, 16, 8, 32, 16

    key = jax.random.PRNGKey(0)
    k_pos, k_ts, k_wp, k_wt, k_wl, k_b = jax.random.split(key, 6)

    position = jax.random.normal(k_pos, (B, P), dtype=jnp.float32)
    timestamp = jax.random.normal(k_ts, (B, T), dtype=jnp.float32)

    # Deterministic synthetic parameters (PyTorch Linear weight shape = [out, in]).
    init_scale = 0.5
    wp = init_scale * jax.random.normal(k_wp, (L, P), dtype=jnp.float32) / jnp.sqrt(P)
    wt = init_scale * jax.random.normal(k_wt, (L, T), dtype=jnp.float32) / jnp.sqrt(T)
    wl = init_scale * jax.random.normal(k_wl, (O, L), dtype=jnp.float32) / jnp.sqrt(L)
    bias = 0.01 * jax.random.normal(k_b, (O,), dtype=jnp.float32)

    out = binding_model_forward(position, timestamp, wp, wt, wl, bias)
    out = jax.block_until_ready(out)

    ref = reference_forward(position, timestamp, wp, wt, wl, bias)
    assert out.shape == (B, O)
    max_err = float(jnp.max(jnp.abs(out - ref)))
    assert jnp.allclose(out, ref, atol=2e-3, rtol=1e-2), f"mismatch vs reference (max err {max_err})"

    print("KERNEL_OK")
</pallas_src>

<mosaic_0001>
module attributes {stable_mosaic.version = 11 : i64} {
  func.func @binding_kernel(%arg0: i32, %arg1: memref<256x16xf32, #tpu.memory_space<vmem>>, %arg2: memref<256x8xf32, #tpu.memory_space<vmem>>, %arg3: memref<32x16xf32, #tpu.memory_space<vmem>>, %arg4: memref<32x8xf32, #tpu.memory_space<vmem>>, %arg5: memref<16x32xf32, #tpu.memory_space<vmem>>, %arg6: memref<1x16xf32, #tpu.memory_space<vmem>>, %arg7: memref<256x16xf32, #tpu.memory_space<vmem>>) attributes {dimension_semantics = [#tpu.dimension_semantics<parallel>], iteration_bounds = array<i64: 1>, scalar_prefetch = 0 : i64, scratch_operands = 0 : i64, tpu.core_type = #tpu.core_type<tc>, window_params = [{transform_indices = @transform_0, window_bounds = array<i64: 256, 16>}, {transform_indices = @transform_1, window_bounds = array<i64: 256, 8>}, {pipeline_mode = #tpu.pipeline_mode<synchronous>, transform_indices = @transform_2, window_bounds = array<i64: 32, 16>}, {pipeline_mode = #tpu.pipeline_mode<synchronous>, transform_indices = @transform_3, window_bounds = array<i64: 32, 8>}, {pipeline_mode = #tpu.pipeline_mode<synchronous>, transform_indices = @transform_4, window_bounds = array<i64: 16, 32>}, {pipeline_mode = #tpu.pipeline_mode<synchronous>, transform_indices = @transform_5, window_bounds = array<i64: 1, 16>}, {transform_indices = @transform_6, window_bounds = array<i64: 256, 16>}]} {
    %c0 = arith.constant 0 : index
    %c0_0 = arith.constant 0 : index
    %0 = vector.load %arg1[%c0, %c0_0] : memref<256x16xf32, #tpu.memory_space<vmem>>, vector<256x16xf32>
    %c0_1 = arith.constant 0 : index
    %c0_2 = arith.constant 0 : index
    %1 = vector.load %arg3[%c0_1, %c0_2] : memref<32x16xf32, #tpu.memory_space<vmem>>, vector<32x16xf32>
    %cst = arith.constant dense<0.000000e+00> : vector<256x32xf32>
    %2 = tpu.matmul %0, %1, %cst {dimension_numbers = #tpu.dot_dimension_numbers<[1], [1], [0], [0], [0, 0, 1, 0], [], []>} : vector<256x16xf32>, vector<32x16xf32>, vector<256x32xf32> -> vector<256x32xf32>
    %c0_3 = arith.constant 0 : index
    %c0_4 = arith.constant 0 : index
    %3 = vector.load %arg2[%c0_3, %c0_4] : memref<256x8xf32, #tpu.memory_space<vmem>>, vector<256x8xf32>
    %c0_5 = arith.constant 0 : index
    %c0_6 = arith.constant 0 : index
    %4 = vector.load %arg4[%c0_5, %c0_6] : memref<32x8xf32, #tpu.memory_space<vmem>>, vector<32x8xf32>
    %cst_7 = arith.constant dense<0.000000e+00> : vector<256x32xf32>
    %5 = tpu.matmul %3, %4, %cst_7 {dimension_numbers = #tpu.dot_dimension_numbers<[1], [1], [0], [0], [0, 0, 1, 0], [], []>} : vector<256x8xf32>, vector<32x8xf32>, vector<256x32xf32> -> vector<256x32xf32>
    %6 = arith.mulf %2, %5 : vector<256x32xf32>
    %c0_8 = arith.constant 0 : index
    %c0_9 = arith.constant 0 : index
    %7 = vector.load %arg5[%c0_8, %c0_9] : memref<16x32xf32, #tpu.memory_space<vmem>>, vector<16x32xf32>
    %cst_10 = arith.constant dense<0.000000e+00> : vector<256x16xf32>
    %8 = tpu.matmul %6, %7, %cst_10 {dimension_numbers = #tpu.dot_dimension_numbers<[1], [1], [0], [0], [0, 0, 1, 0], [], []>} : vector<256x32xf32>, vector<16x32xf32>, vector<256x16xf32> -> vector<256x16xf32>
    %c0_11 = arith.constant 0 : index
    %c0_12 = arith.constant 0 : index
    %9 = vector.load %arg6[%c0_11, %c0_12] : memref<1x16xf32, #tpu.memory_space<vmem>>, vector<1x16xf32>
    %10 = vector.broadcast %9 : vector<1x16xf32> to vector<256x16xf32>
    %11 = arith.addf %8, %10 : vector<256x16xf32>
    %cst_13 = arith.constant 0.000000e+00 : f32
    %12 = vector.broadcast %cst_13 : f32 to vector<256x16xf32>
    %13 = arith.maximumf %11, %12 : vector<256x16xf32>
    %c0_14 = arith.constant 0 : index
    %c0_15 = arith.constant 0 : index
    %14 = vector.load %arg7[%c0_14, %c0_15] : memref<256x16xf32, #tpu.memory_space<vmem>>, vector<256x16xf32>
    tpu.vector_store %arg7[%c0_14, %c0_15], %13 {strides = array<i32>} : memref<256x16xf32, #tpu.memory_space<vmem>>, vector<256x16xf32>,
    return
  }
  func.func @transform_0(%arg0: i32) -> (i32, i32) {
    %c0_i32 = arith.constant 0 : i32
    %c0_i32_0 = arith.constant 0 : i32
    return %arg0, %c0_i32 : i32, i32
  }
  func.func @transform_1(%arg0: i32) -> (i32, i32) {
    %c0_i32 = arith.constant 0 : i32
    %c0_i32_0 = arith.constant 0 : i32
    return %arg0, %c0_i32 : i32, i32
  }
  func.func @transform_2(%arg0: i32) -> (i32, i32) {
    %c0_i32 = arith.constant 0 : i32
    %c0_i32_0 = arith.constant 0 : i32
    %c0_i32_1 = arith.constant 0 : i32
    return %c0_i32, %c0_i32_0 : i32, i32
  }
  func.func @transform_3(%arg0: i32) -> (i32, i32) {
    %c0_i32 = arith.constant 0 : i32
    %c0_i32_0 = arith.constant 0 : i32
    %c0_i32_1 = arith.constant 0 : i32
    return %c0_i32, %c0_i32_0 : i32, i32
  }
  func.func @transform_4(%arg0: i32) -> (i32, i32) {
    %c0_i32 = arith.constant 0 : i32
    %c0_i32_0 = arith.constant 0 : i32
    %c0_i32_1 = arith.constant 0 : i32
    return %c0_i32, %c0_i32_0 : i32, i32
  }
  func.func @transform_5(%arg0: i32) -> (i32, i32) {
    %c0_i32 = arith.constant 0 : i32
    %c0_i32_0 = arith.constant 0 : i32
    %c0_i32_1 = arith.constant 0 : i32
    return %c0_i32, %c0_i32_0 : i32, i32
  }
  func.func @transform_6(%arg0: i32) -> (i32, i32) {
    %c0_i32 = arith.constant 0 : i32
    %c0_i32_0 = arith.constant 0 : i32
    return %arg0, %c0_i32 : i32, i32
  }
}

</mosaic_0001>

<bundles_post_ra>
// kernel: tpu_custom_call.1
= control target key start
LH: loop header
LB: loop body
LE: loop exit
PB: predicated region body
PF: predicated region fallthrough
CT: control target
= control target key end

     0   :  { %vm59_vm0 = vcmask 130048   ;;  %vm317_vm1 = vcmask 64512   ;;  %vm577_vm2 = vcmask 261120   ;;  %s1531_s2 = inlined_call_operand.vmem [shape: f32[32,16], index: 2, kind: input, shape index: {}]   ;;  %s1532_s3 = inlined_call_operand.vmem [shape: f32[32,8], index: 3, kind: input, shape index: {}]   ;;  %s1533_s0 = inlined_call_operand.vmem [shape: f32[256,16], index: 0, kind: input, shape index: {}]   ;;  %s1534_s1 = inlined_call_operand.vmem [shape: f32[256,8], index: 1, kind: input, shape index: {}]   ;;  %s1535_s4 = inlined_call_operand.vmem [shape: f32[16,32], index: 4, kind: input, shape index: {}]   ;;  %s1536_s5 = inlined_call_operand.vmem [shape: f32[1,16], index: 5, kind: input, shape index: {}]   ;;  %s1537_s6 = inlined_call_operand.vmem [shape: f32[256,16], index: 6, kind: output, shape index: {}]  }
   0x1   :  { %v58_v0 = vld [vmem:[%s1531_s2 + $0x18] sm:$0xff]  ;;  %v57_v2 = vld [vmem:[%s1531_s2 + $0x10] sm:$0xff]  ;;  %v56_v4 = vld [vmem:[%s1531_s2 + $0x8] sm:$0xff] }
   0x2   :  { %v316_v1 = vld [vmem:[%s1532_s3 + $0x18] sm:$0xff]  ;;  %861 = vmatpush.xpose.msk.msra.mxu0 %vm59_vm0, %v58_v0  ;;  %967 = vmatpush.xpose.msk.msra.mxu3 %vm59_vm0, %v58_v0  ;;  %v315_v3 = vld [vmem:[%s1532_s3 + $0x10] sm:$0xff]  ;;  %v314_v5 = vld [vmem:[%s1532_s3 + $0x8] sm:$0xff] }
   0x3   :  { %897 = vmatpush.xpose.msk.msra.mxu1 %vm317_vm1, %v316_v1  ;;  %v55_v6 = vld [vmem:[%s1531_s2] sm:$0xff]  ;;  %v24_v11 = vld [vmem:[%s1533_s0 + $0x8] sm:$0xff]  ;;  %v25_v14 = vld [vmem:[%s1533_s0 + $0x10] sm:$0xff] }
   0x4   :  { %v313_v7 = vld [vmem:[%s1532_s3] sm:$0xff]  ;;  %v282_v12 = vld [vmem:[%s1534_s1 + $0x8] sm:$0xff]  ;;  %v283_v15 = vld [vmem:[%s1534_s1 + $0x10] sm:$0xff] }
   0x5   :  { %v23_v8 = vld [vmem:[%s1533_s0] sm:$0xff]  ;;  %v48_v13 = vld [vmem:[%s1533_s0 + $0xc8] sm:$0xff]  ;;  %v49_v16 = vld [vmem:[%s1533_s0 + $0xd0] sm:$0xff] }
   0x6   :  { %862 = vmatpush.xpose.msk.msra.mxu0 %vm59_vm0, %v57_v2  ;;  %968 = vmatpush.xpose.msk.msra.mxu3 %vm59_vm0, %v57_v2  ;;  %v281_v9 = vld [vmem:[%s1534_s1] sm:$0xff]  ;;  %v26_v17 = vld [vmem:[%s1533_s0 + $0x18] sm:$0xff]  ;;  %v28_v23 = vld [vmem:[%s1533_s0 + $0x28] sm:$0xff] }
   0x7   :  { %898 = vmatpush.xpose.msk.msra.mxu1 %vm317_vm1, %v315_v3  ;;  %v47_v10 = vld [vmem:[%s1533_s0 + $0xc0] sm:$0xff]  ;;  %v284_v18 = vld [vmem:[%s1534_s1 + $0x18] sm:$0xff]  ;;  %v286_v24 = vld [vmem:[%s1534_s1 + $0x28] sm:$0xff] }
   0x8   :  { %v50_v19 = vld [vmem:[%s1533_s0 + $0xd8] sm:$0xff]  ;;  %v27_v20 = vld [vmem:[%s1533_s0 + $0x20] sm:$0xff]  ;;  %v52_v25 = vld [vmem:[%s1533_s0 + $0xe8] sm:$0xff] }
   0x9   :  { %v285_v21 = vld [vmem:[%s1534_s1 + $0x20] sm:$0xff]  ;;  %v29_v26 = vld [vmem:[%s1533_s0 + $0x30] sm:$0xff]  ;;  %v30_v29 = vld [vmem:[%s1533_s0 + $0x38] sm:$0xff] }
   0xa   :  { %863 = vmatpush.xpose.msk.msra.mxu0 %vm59_vm0, %v56_v4  ;;  %969 = vmatpush.xpose.msk.msra.mxu3 %vm59_vm0, %v56_v4  ;;  %v51_v22 = vld [vmem:[%s1533_s0 + $0xe0] sm:$0xff]  ;;  %v287_v27 = vld [vmem:[%s1534_s1 + $0x30] sm:$0xff]  ;;  %v288_v30 = vld [vmem:[%s1534_s1 + $0x38] sm:$0xff] }
   0xb   :  { %899 = vmatpush.xpose.msk.msra.mxu1 %vm317_vm1, %v314_v5  ;;  %v53_v28 = vld [vmem:[%s1533_s0 + $0xf0] sm:$0xff]  ;;  %v54_v31 = vld [vmem:[%s1533_s0 + $0xf8] sm:$0xff]  ;;  %v31_v32 = vld [vmem:[%s1533_s0 + $0x40] sm:$0xff] }
   0xc   :  { %v289_v33 = vld [vmem:[%s1534_s1 + $0x40] sm:$0xff]  ;;  %v32_v35 = vld [vmem:[%s1533_s0 + $0x48] sm:$0xff]  ;;  %v33_v38 = vld [vmem:[%s1533_s0 + $0x50] sm:$0xff] }
   0xd   :  { %v305_v34 = vld [vmem:[%s1534_s1 + $0xc0] sm:$0xff]  ;;  %v290_v36 = vld [vmem:[%s1534_s1 + $0x48] sm:$0xff]  ;;  %v291_v39 = vld [vmem:[%s1534_s1 + $0x50] sm:$0xff] }
   0xe   :  { %864 = vmatpush.xpose.msk.msra.mxu0 %vm59_vm0, %v55_v6  ;;  %970 = vmatpush.xpose.msk.msra.mxu3 %vm59_vm0, %v55_v6  ;;  %v306_v37 = vld [vmem:[%s1534_s1 + $0xc8] sm:$0xff]  ;;  %v307_v40 = vld [vmem:[%s1534_s1 + $0xd0] sm:$0xff]  ;;  %v34_v41 = vld [vmem:[%s1533_s0 + $0x58] sm:$0xff] }
   0xf   :  { %900 = vmatpush.xpose.msk.msra.mxu1 %vm317_vm1, %v313_v7  ;;  %v292_v42 = vld [vmem:[%s1534_s1 + $0x58] sm:$0xff]  ;;  %v572_v44 = vld [vmem:[%s1535_s4 + $0x8] sm:$0xff]  ;;  %v571_v45 = vld [vmem:[%s1535_s4] sm:$0xff] }
  0x10   :  { %v308_v43 = vld [vmem:[%s1534_s1 + $0xd8] sm:$0xff]  ;;  %933 = vmatpush.xpose.msk.msra.mxu2 %vm577_vm2, %v572_v44  ;;  %v35_v46 = vld [vmem:[%s1533_s0 + $0x60] sm:$0xff]  ;;  %v36_v49 = vld [vmem:[%s1533_s0 + $0x68] sm:$0xff] }
  0x11   :  { %865 = vmatmul.msk.f32.vlgmr.msra.gmra.mxu0 %vm59_vm0, %v23_v8  ;;  %889 = vmatmul.msk.f32.vlgmr.msra.gmra.mxu3 %vm59_vm0, %v47_v10  ;;  %v293_v47 = vld [vmem:[%s1534_s1 + $0x60] sm:$0xff]  ;;  %v294_v50 = vld [vmem:[%s1534_s1 + $0x68] sm:$0xff]  ;;  %v37_v52 = vld [vmem:[%s1533_s0 + $0x70] sm:$0xff] }
  0x12   :  { %971 = vmatpush.xpose.msk.msrb.mxu3 %vm317_vm1, %v316_v1  ;;  %901 = vmatmul.msk.f32.vlgmr.msra.gmra.mxu1 %vm317_vm1, %v281_v9  ;;  %v309_v48 = vld [vmem:[%s1534_s1 + $0xe0] sm:$0xff]  ;;  %v310_v51 = vld [vmem:[%s1534_s1 + $0xe8] sm:$0xff]  ;;  %v295_v53 = vld [vmem:[%s1534_s1 + $0x70] sm:$0xff] }
  0x13   :  { %v311_v54 = vld [vmem:[%s1534_s1 + $0xf0] sm:$0xff]  ;;  %v38_v55 = vld [vmem:[%s1533_s0 + $0x78] sm:$0xff]  ;;  %v39_v60 = vld [vmem:[%s1533_s0 + $0x80] sm:$0xff] }
  0x14   :  { %934 = vmatpush.xpose.msk.msra.mxu2 %vm577_vm2, %v571_v45  ;;  %v296_v56 = vld [vmem:[%s1534_s1 + $0x78] sm:$0xff]  ;;  %v297_v61 = vld [vmem:[%s1534_s1 + $0x80] sm:$0xff]  ;;  %v40_v2 = vld [vmem:[%s1533_s0 + $0x88] sm:$0xff] }
  0x15   :  { %v312_v57 = vld [vmem:[%s1534_s1 + $0xf8] sm:$0xff]  ;;  %v41_v8 = vld [vmem:[%s1533_s0 + $0x90] sm:$0xff] }
  0x16   :  { %972 = vmatpush.xpose.msk.msrb.mxu3 %vm317_vm1, %v315_v3  ;;  %v298_v3 = vld [vmem:[%s1534_s1 + $0x88] sm:$0xff]  ;;  %v299_v9 = vld [vmem:[%s1534_s1 + $0x90] sm:$0xff] }
  0x19   :  { %866 = vmatmul.msk.f32.gmra.mxu0 %vm59_vm0, %v24_v11  ;;  %890 = vmatmul.msk.f32.gmra.mxu3 %vm59_vm0, %v48_v13 }
  0x1a   :  { %973 = vmatpush.xpose.msk.msrb.mxu3 %vm317_vm1, %v314_v5  ;;  %902 = vmatmul.msk.f32.gmra.mxu1 %vm317_vm1, %v282_v12 }
  0x1e   :  { %974 = vmatpush.xpose.msk.msrb.mxu3 %vm317_vm1, %v313_v7 }
  0x21   :  { %867 = vmatmul.msk.f32.gmra.mxu0 %vm59_vm0, %v25_v14  ;;  %891 = vmatmul.msk.f32.gmra.mxu3 %vm59_vm0, %v49_v16  ;;  %v42_v14 = vld [vmem:[%s1533_s0 + $0x98] sm:$0xff] }
  0x22   :  { %903 = vmatmul.msk.f32.gmra.mxu1 %vm317_vm1, %v283_v15  ;;  %975 = vmatpush.xpose.msk.msra.mxu3 %vm577_vm2, %v572_v44  ;;  %v300_v15 = vld [vmem:[%s1534_s1 + $0x98] sm:$0xff] }
  0x26   :  { %976 = vmatpush.xpose.msk.msra.mxu3 %vm577_vm2, %v571_v45 }
  0x29   :  { %868 = vmatmul.msk.f32.gmra.mxu0 %vm59_vm0, %v26_v17  ;;  %892 = vmatmul.msk.f32.gmra.mxu3 %vm59_vm0, %v50_v19 }
  0x2a   :  { %904 = vmatmul.msk.f32.gmra.mxu1 %vm317_vm1, %v284_v18 }
  0x31   :  { %869 = vmatmul.msk.f32.gmra.mxu0 %vm59_vm0, %v27_v20  ;;  %893 = vmatmul.msk.f32.gmra.mxu3 %vm59_vm0, %v51_v22  ;;  %v43_v20 = vld [vmem:[%s1533_s0 + $0xa0] sm:$0xff] }
  0x32   :  { %905 = vmatmul.msk.f32.gmra.mxu1 %vm317_vm1, %v285_v21  ;;  %v301_v21 = vld [vmem:[%s1534_s1 + $0xa0] sm:$0xff] }
  0x39   :  { %870 = vmatmul.msk.f32.gmra.mxu0 %vm59_vm0, %v28_v23  ;;  %894 = vmatmul.msk.f32.gmra.mxu3 %vm59_vm0, %v52_v25 }
  0x3a   :  { %906 = vmatmul.msk.f32.gmra.mxu1 %vm317_vm1, %v286_v24 }
  0x41   :  { %871 = vmatmul.msk.f32.gmra.mxu0 %vm59_vm0, %v29_v26  ;;  %895 = vmatmul.msk.f32.gmra.mxu3 %vm59_vm0, %v53_v28  ;;  %v44_v26 = vld [vmem:[%s1533_s0 + $0xa8] sm:$0xff] }
  0x42   :  { %907 = vmatmul.msk.f32.gmra.mxu1 %vm317_vm1, %v287_v27  ;;  %v302_v27 = vld [vmem:[%s1534_s1 + $0xa8] sm:$0xff] }
  0x49   :  { %872 = vmatmul.msk.f32.gmra.mxu0 %vm59_vm0, %v30_v29  ;;  %896 = vmatmul.msk.f32.gmra.mxu3 %vm59_vm0, %v54_v31 }
  0x4a   :  { %908 = vmatmul.msk.f32.gmra.mxu1 %vm317_vm1, %v288_v30 }
  0x51   :  { %873 = vmatmul.msk.f32.gmra.mxu0 %vm59_vm0, %v31_v32  ;;  %925 = vmatmul.msk.f32.vlgmr.msrb.gmra.mxu3 %vm317_vm1, %v305_v34  ;;  %v45_v32 = vld [vmem:[%s1533_s0 + $0xb0] sm:$0xff] }
  0x52   :  { %909 = vmatmul.msk.f32.gmra.mxu1 %vm317_vm1, %v289_v33  ;;  %v303_v33 = vld [vmem:[%s1534_s1 + $0xb0] sm:$0xff] }
  0x59   :  { %874 = vmatmul.msk.f32.gmra.mxu0 %vm59_vm0, %v32_v35  ;;  %926 = vmatmul.msk.f32.gmra.mxu3 %vm317_vm1, %v306_v37 }
  0x5a   :  { %910 = vmatmul.msk.f32.gmra.mxu1 %vm317_vm1, %v290_v36 }
  0x61   :  { %875 = vmatmul.msk.f32.gmra.mxu0 %vm59_vm0, %v33_v38  ;;  %927 = vmatmul.msk.f32.gmra.mxu3 %vm317_vm1, %v307_v40  ;;  %v46_v38 = vld [vmem:[%s1533_s0 + $0xb8] sm:$0xff] }
  0x62   :  { %911 = vmatmul.msk.f32.gmra.mxu1 %vm317_vm1, %v291_v39  ;;  %v304_v39 = vld [vmem:[%s1534_s1 + $0xb8] sm:$0xff] }
  0x69   :  { %876 = vmatmul.msk.f32.gmra.mxu0 %vm59_vm0, %v34_v41  ;;  %928 = vmatmul.msk.f32.gmra.mxu3 %vm317_vm1, %v308_v43 }
  0x6a   :  { %912 = vmatmul.msk.f32.gmra.mxu1 %vm317_vm1, %v292_v42 }
  0x71   :  { %877 = vmatmul.msk.f32.gmra.mxu0 %vm59_vm0, %v35_v46  ;;  %929 = vmatmul.msk.f32.gmra.mxu3 %vm317_vm1, %v309_v48 }
  0x72   :  { %913 = vmatmul.msk.f32.gmra.mxu1 %vm317_vm1, %v293_v47 }
  0x79   :  { %878 = vmatmul.msk.f32.gmra.mxu0 %vm59_vm0, %v36_v49  ;;  %930 = vmatmul.msk.f32.gmra.mxu3 %vm317_vm1, %v310_v51 }
  0x7a   :  { %914 = vmatmul.msk.f32.gmra.mxu1 %vm317_vm1, %v294_v50 }
  0x81   :  { %879 = vmatmul.msk.f32.gmra.mxu0 %vm59_vm0, %v37_v52  ;;  %931 = vmatmul.msk.f32.gmra.mxu3 %vm317_vm1, %v311_v54 }
  0x82   :  { %915 = vmatmul.msk.f32.gmra.mxu1 %vm317_vm1, %v295_v53 }
  0x89   :  { %880 = vmatmul.msk.f32.gmra.mxu0 %vm59_vm0, %v38_v55  ;;  %932 = vmatmul.msk.f32.gmra.mxu3 %vm317_vm1, %v312_v57 }
  0x8a   :  { %916 = vmatmul.msk.f32.gmra.mxu1 %vm317_vm1, %v296_v56 }
  0x8e   :  { %v185_v58 = vpop.f32.mrf.mxu0 }
  0x8f   :  { %v443_v59 = vpop.f32.mrf.mxu1 }
  0x90   :  { %v539_v62 = vmul.f32 %v443_v59, %v185_v58 }
  0x91   :  { %881 = vmatmul.msk.f32.gmra.mxu0 %vm59_vm0, %v39_v60 }
  0x92   :  { %917 = vmatmul.msk.f32.gmra.mxu1 %vm317_vm1, %v297_v61  ;;  %935 = vmatmul.msk.f32.vlgmr.msra.gmra.mxu2 %vm577_vm2, %v539_v62 }
  0x94   :  { %v1264_v63 = vpop.f32.mrf.mxu3 }
  0x96   :  { %v188_v0 = vpop.f32.mrf.mxu0 }
  0x97   :  { %v446_v1 = vpop.f32.mrf.mxu1 }
  0x98   :  { %v540_v4 = vmul.f32 %v446_v1, %v188_v0 }
  0x99   :  { %882 = vmatmul.msk.f32.gmra.mxu0 %vm59_vm0, %v40_v2 }
  0x9a   :  { %918 = vmatmul.msk.f32.gmra.mxu1 %vm317_vm1, %v298_v3  ;;  %936 = vmatmul.msk.f32.gmra.mxu2 %vm577_vm2, %v540_v4 }
  0x9c   :  { %v1275_v5 = vpop.f32.mrf.mxu3 }
  0x9e   :  { %v191_v6 = vpop.f32.mrf.mxu0 }
  0x9f   :  { %v449_v7 = vpop.f32.mrf.mxu1 }
  0xa0   :  { %v541_v10 = vmul.f32 %v449_v7, %v191_v6 }
  0xa1   :  { %883 = vmatmul.msk.f32.gmra.mxu0 %vm59_vm0, %v41_v8 }
  0xa2   :  { %919 = vmatmul.msk.f32.gmra.mxu1 %vm317_vm1, %v299_v9  ;;  %937 = vmatmul.msk.f32.gmra.mxu2 %vm577_vm2, %v541_v10 }
  0xa4   :  { %v1286_v11 = vpop.f32.mrf.mxu3 }
  0xa6   :  { %v194_v12 = vpop.f32.mrf.mxu0 }
  0xa7   :  { %v452_v13 = vpop.f32.mrf.mxu1 }
  0xa8   :  { %v542_v16 = vmul.f32 %v452_v13, %v194_v12 }
  0xa9   :  { %884 = vmatmul.msk.f32.gmra.mxu0 %vm59_vm0, %v42_v14 }
  0xaa   :  { %920 = vmatmul.msk.f32.gmra.mxu1 %vm317_vm1, %v300_v15  ;;  %938 = vmatmul.msk.f32.gmra.mxu2 %vm577_vm2, %v542_v16 }
  0xac   :  { %v1297_v17 = vpop.f32.mrf.mxu3 }
  0xae   :  { %v197_v18 = vpop.f32.mrf.mxu0 }
  0xaf   :  { %v455_v19 = vpop.f32.mrf.mxu1 }
  0xb0   :  { %v543_v22 = vmul.f32 %v455_v19, %v197_v18 }
  0xb1   :  { %885 = vmatmul.msk.f32.gmra.mxu0 %vm59_vm0, %v43_v20 }
  0xb2   :  { %921 = vmatmul.msk.f32.gmra.mxu1 %vm317_vm1, %v301_v21  ;;  %939 = vmatmul.msk.f32.gmra.mxu2 %vm577_vm2, %v543_v22  ;;  %v1360_v21 = vld [vmem:[%s1536_s5] ss:$0 sm:$0xff] }
  0xb4   :  { %v269_v23 = vpop.f32.mrf.mxu3 }
  0xb6   :  { %v200_v24 = vpop.f32.mrf.mxu0 }
  0xb7   :  { %v458_v25 = vpop.f32.mrf.mxu1 }
  0xb8   :  { %v544_v28 = vmul.f32 %v458_v25, %v200_v24 }
  0xb9   :  { %886 = vmatmul.msk.f32.gmra.mxu0 %vm59_vm0, %v44_v26 }
  0xba   :  { %922 = vmatmul.msk.f32.gmra.mxu1 %vm317_vm1, %v302_v27  ;;  %940 = vmatmul.msk.f32.gmra.mxu2 %vm577_vm2, %v544_v28 }
  0xbc   :  { %v272_v29 = vpop.f32.mrf.mxu3 }
  0xbe   :  { %v203_v30 = vpop.f32.mrf.mxu0 }
  0xbf   :  { %v461_v31 = vpop.f32.mrf.mxu1 }
  0xc0   :  { %v545_v34 = vmul.f32 %v461_v31, %v203_v30 }
  0xc1   :  { %887 = vmatmul.msk.f32.gmra.mxu0 %vm59_vm0, %v45_v32 }
  0xc2   :  { %923 = vmatmul.msk.f32.gmra.mxu1 %vm317_vm1, %v303_v33  ;;  %941 = vmatmul.msk.f32.gmra.mxu2 %vm577_vm2, %v545_v34 }
  0xc4   :  { %v275_v35 = vpop.f32.mrf.mxu3 }
  0xc6   :  { %v206_v36 = vpop.f32.mrf.mxu0 }
  0xc7   :  { %v464_v37 = vpop.f32.mrf.mxu1 }
  0xc8   :  { %v546_v40 = vmul.f32 %v464_v37, %v206_v36 }
  0xc9   :  { %888 = vmatmul.msk.f32.gmra.mxu0 %vm59_vm0, %v46_v38 }
  0xca   :  { %924 = vmatmul.msk.f32.gmra.mxu1 %vm317_vm1, %v304_v39  ;;  %942 = vmatmul.msk.f32.gmra.mxu2 %vm577_vm2, %v546_v40 }
  0xcc   :  { %v278_v41 = vpop.f32.mrf.mxu3 }
  0xce   :  { %v209_v42 = vpop.f32.mrf.mxu0 }
  0xcf   :  { %v467_v43 = vpop.f32.mrf.mxu1 }
  0xd0   :  { %v547_v44 = vmul.f32 %v467_v43, %v209_v42 }
  0xd2   :  { %943 = vmatmul.msk.f32.gmra.mxu2 %vm577_vm2, %v547_v44 }
  0xd4   :  { %v515_v45 = vpop.f32.mrf.mxu3 }
  0xd5   :  { %v1337_v48 = vmul.f32 %v515_v45, %v1264_v63 }
  0xd6   :  { %v212_v46 = vpop.f32.mrf.mxu0 }
  0xd7   :  { %v470_v47 = vpop.f32.mrf.mxu1 }
  0xd8   :  { %v548_v49 = vmul.f32 %v470_v47, %v212_v46 }
  0xda   :  { %944 = vmatmul.msk.f32.gmra.mxu2 %vm577_vm2, %v548_v49 }
  0xdc   :  { %v518_v50 = vpop.f32.mrf.mxu3 }
  0xdd   :  { %v564_v53 = vmul.f32 %v518_v50, %v1275_v5 }
  0xde   :  { %v215_v51 = vpop.f32.mrf.mxu0 }
  0xdf   :  { %v473_v52 = vpop.f32.mrf.mxu1  ;;  %960 = vmatmul.msk.f32.vlgmr.msra.gmra.mxu3 %vm577_vm2, %v564_v53 }
  0xe0   :  { %v549_v54 = vmul.f32 %v473_v52, %v215_v51 }
  0xe2   :  { %945 = vmatmul.msk.f32.gmra.mxu2 %vm577_vm2, %v549_v54 }
  0xe4   :  { %v521_v55 = vpop.f32.mrf.mxu3 }
  0xe5   :  { %v565_v58 = vmul.f32 %v521_v55, %v1286_v11 }
  0xe6   :  { %v218_v56 = vpop.f32.mrf.mxu0 }
  0xe7   :  { %v476_v57 = vpop.f32.mrf.mxu1  ;;  %961 = vmatmul.msk.f32.gmra.mxu3 %vm577_vm2, %v565_v58 }
  0xe8   :  { %v550_v59 = vmul.f32 %v476_v57, %v218_v56 }
  0xea   :  { %946 = vmatmul.msk.f32.gmra.mxu2 %vm577_vm2, %v550_v59 }
  0xec   :  { %v524_v60 = vpop.f32.mrf.mxu3 }
  0xed   :  { %v566_v63 = vmul.f32 %v524_v60, %v1297_v17 }
  0xee   :  { %v221_v61 = vpop.f32.mrf.mxu0 }
  0xef   :  { %v479_v62 = vpop.f32.mrf.mxu1  ;;  %962 = vmatmul.msk.f32.gmra.mxu3 %vm577_vm2, %v566_v63 }
  0xf0   :  { %v551_v0 = vmul.f32 %v479_v62, %v221_v61 }
  0xf2   :  { %947 = vmatmul.msk.f32.gmra.mxu2 %vm577_vm2, %v551_v0 }
  0xf4   :  { %v527_v1 = vpop.f32.mrf.mxu3 }
  0xf5   :  { %v567_v4 = vmul.f32 %v527_v1, %v269_v23 }
  0xf6   :  { %v224_v2 = vpop.f32.mrf.mxu0 }
  0xf7   :  { %v482_v3 = vpop.f32.mrf.mxu1  ;;  %963 = vmatmul.msk.f32.gmra.mxu3 %vm577_vm2, %v567_v4 }
  0xf8   :  { %v552_v5 = vmul.f32 %v482_v3, %v224_v2 }
  0xfa   :  { %948 = vmatmul.msk.f32.gmra.mxu2 %vm577_vm2, %v552_v5 }
  0xfc   :  { %v530_v6 = vpop.f32.mrf.mxu3 }
  0xfd   :  { %v568_v9 = vmul.f32 %v530_v6, %v272_v29 }
  0xfe   :  { %v227_v7 = vpop.f32.mrf.mxu0 }
  0xff   :  { %v485_v8 = vpop.f32.mrf.mxu1  ;;  %964 = vmatmul.msk.f32.gmra.mxu3 %vm577_vm2, %v568_v9 }
 0x100   :  { %v553_v10 = vmul.f32 %v485_v8, %v227_v7 }
 0x102   :  { %949 = vmatmul.msk.f32.gmra.mxu2 %vm577_vm2, %v553_v10 }
 0x104   :  { %v533_v11 = vpop.f32.mrf.mxu3 }
 0x105   :  { %v569_v14 = vmul.f32 %v533_v11, %v275_v35 }
 0x106   :  { %v230_v12 = vpop.f32.mrf.mxu0 }
 0x107   :  { %v488_v13 = vpop.f32.mrf.mxu1  ;;  %965 = vmatmul.msk.f32.gmra.mxu3 %vm577_vm2, %v569_v14 }
 0x108   :  { %v554_v15 = vmul.f32 %v488_v13, %v230_v12 }
 0x10a   :  { %950 = vmatmul.msk.f32.gmra.mxu2 %vm577_vm2, %v554_v15 }
 0x10c   :  { %v536_v16 = vpop.f32.mrf.mxu3 }
 0x10d   :  { %v570_v19 = vmul.f32 %v536_v16, %v278_v41 }
 0x10e   :  { %v233_v17 = vpop.f32.mrf.mxu0 }
 0x10f   :  { %v491_v18 = vpop.f32.mrf.mxu1  ;;  %966 = vmatmul.msk.f32.gmra.mxu3 %vm577_vm2, %v570_v19 }
 0x110   :  { %v555_v20 = vmul.f32 %v491_v18, %v233_v17 }
 0x112   :  { %951 = vmatmul.msk.f32.gmra.mxu2 %vm577_vm2, %v555_v20 }
 0x115   :  { %v697_v22 = vpop.f32.mrf.mxu2 }
 0x116   :  { %v698_v23 = vadd.f32 %v1360_v21, %v697_v22  ;;  %v236_v24 = vpop.f32.mrf.mxu0 }
 0x117   :  { %v494_v25 = vpop.f32.mrf.mxu1 }
 0x118   :  { %v556_v26 = vmul.f32 %v494_v25, %v236_v24  ;;  %v793_v27 = vmax.f32 %v698_v23, 0.0 }
 0x11a   :  { %825 = vst.msk [vmem:[%s1537_s6] sm:$0xff] %vm59_vm0, %v793_v27  ;;  %952 = vmatmul.msk.f32.gmra.mxu2 %vm577_vm2, %v556_v26 }
 0x11d   :  { %v700_v28 = vpop.f32.mrf.mxu2 }
 0x11e   :  { %v701_v29 = vadd.f32 %v1360_v21, %v700_v28  ;;  %v239_v30 = vpop.f32.mrf.mxu0 }
 0x11f   :  { %v497_v31 = vpop.f32.mrf.mxu1 }
 0x120   :  { %v557_v32 = vmul.f32 %v497_v31, %v239_v30  ;;  %v794_v33 = vmax.f32 %v701_v29, 0.0 }
 0x122   :  { %826 = vst.msk [vmem:[%s1537_s6 + $0x8] sm:$0xff] %vm59_vm0, %v794_v33  ;;  %953 = vmatmul.msk.f32.gmra.mxu2 %vm577_vm2, %v557_v32 }
 0x125   :  { %v703_v34 = vpop.f32.mrf.mxu2 }
 0x126   :  { %v704_v35 = vadd.f32 %v1360_v21, %v703_v34  ;;  %v242_v36 = vpop.f32.mrf.mxu0 }
 0x127   :  { %v500_v37 = vpop.f32.mrf.mxu1 }
 0x128   :  { %v558_v38 = vmul.f32 %v500_v37, %v242_v36  ;;  %v795_v39 = vmax.f32 %v704_v35, 0.0 }
 0x12a   :  { %827 = vst.msk [vmem:[%s1537_s6 + $0x10] sm:$0xff] %vm59_vm0, %v795_v39  ;;  %954 = vmatmul.msk.f32.gmra.mxu2 %vm577_vm2, %v558_v38 }
 0x12d   :  { %v706_v40 = vpop.f32.mrf.mxu2 }
 0x12e   :  { %v707_v41 = vadd.f32 %v1360_v21, %v706_v40  ;;  %v245_v42 = vpop.f32.mrf.mxu0 }
 0x12f   :  { %v503_v43 = vpop.f32.mrf.mxu1 }
 0x130   :  { %v559_v44 = vmul.f32 %v503_v43, %v245_v42  ;;  %v796_v45 = vmax.f32 %v707_v41, 0.0 }
 0x132   :  { %828 = vst.msk [vmem:[%s1537_s6 + $0x18] sm:$0xff] %vm59_vm0, %v796_v45  ;;  %955 = vmatmul.msk.f32.gmra.mxu2 %vm577_vm2, %v559_v44 }
 0x135   :  { %v709_v46 = vpop.f32.mrf.mxu2 }
 0x136   :  { %v710_v47 = vadd.f32 %v1360_v21, %v709_v46  ;;  %v248_v49 = vpop.f32.mrf.mxu0 }
 0x137   :  { %v506_v50 = vpop.f32.mrf.mxu1 }
 0x138   :  { %v560_v51 = vmul.f32 %v506_v50, %v248_v49  ;;  %v797_v52 = vmax.f32 %v710_v47, 0.0 }
 0x13a   :  { %829 = vst.msk [vmem:[%s1537_s6 + $0x20] sm:$0xff] %vm59_vm0, %v797_v52  ;;  %956 = vmatmul.msk.f32.gmra.mxu2 %vm577_vm2, %v560_v51 }
 0x13d   :  { %v712_v53 = vpop.f32.mrf.mxu2 }
 0x13e   :  { %v713_v54 = vadd.f32 %v1360_v21, %v712_v53  ;;  %v251_v55 = vpop.f32.mrf.mxu0 }
 0x13f   :  { %v509_v56 = vpop.f32.mrf.mxu1 }
 0x140   :  { %v561_v57 = vmul.f32 %v509_v56, %v251_v55  ;;  %v798_v58 = vmax.f32 %v713_v54, 0.0 }
 0x142   :  { %830 = vst.msk [vmem:[%s1537_s6 + $0x28] sm:$0xff] %vm59_vm0, %v798_v58  ;;  %957 = vmatmul.msk.f32.gmra.mxu2 %vm577_vm2, %v561_v57 }
 0x145   :  { %v715_v59 = vpop.f32.mrf.mxu2 }
 0x146   :  { %v716_v60 = vadd.f32 %v1360_v21, %v715_v59  ;;  %v254_v61 = vpop.f32.mrf.mxu0 }
 0x147   :  { %v512_v62 = vpop.f32.mrf.mxu1 }
 0x148   :  { %v562_v63 = vmul.f32 %v512_v62, %v254_v61  ;;  %v799_v0 = vmax.f32 %v716_v60, 0.0 }
 0x14a   :  { %831 = vst.msk [vmem:[%s1537_s6 + $0x30] sm:$0xff] %vm59_vm0, %v799_v0  ;;  %958 = vmatmul.msk.f32.gmra.mxu2 %vm577_vm2, %v562_v63 }
 0x14d   :  { %v718_v1 = vpop.f32.mrf.mxu2 }
 0x14e   :  { %v719_v2 = vadd.f32 %v1360_v21, %v718_v1 }
 0x150   :  { %v800_v3 = vmax.f32 %v719_v2, 0.0 }
 0x152   :  { %832 = vst.msk [vmem:[%s1537_s6 + $0x38] sm:$0xff] %vm59_vm0, %v800_v3  ;;  %959 = vmatmul.msk.f32.gmra.mxu2 %vm577_vm2, %v1337_v48 }
 0x155   :  { %v721_v4 = vpop.f32.mrf.mxu2 }
 0x156   :  { %v722_v5 = vadd.f32 %v1360_v21, %v721_v4 }
 0x158   :  { %v801_v6 = vmax.f32 %v722_v5, 0.0 }
 0x15a   :  { %833 = vst.msk [vmem:[%s1537_s6 + $0x40] sm:$0xff] %vm59_vm0, %v801_v6 }
 0x15d   :  { %v724_v7 = vpop.f32.mrf.mxu2 }
 0x15e   :  { %v725_v8 = vadd.f32 %v1360_v21, %v724_v7 }
 0x160   :  { %v802_v9 = vmax.f32 %v725_v8, 0.0 }
 0x162   :  { %834 = vst.msk [vmem:[%s1537_s6 + $0x48] sm:$0xff] %vm59_vm0, %v802_v9  ;;  %v772_v10 = vpop.f32.mrf.mxu3 }
 0x163   :  { %v773_v48 = vadd.f32 %v1360_v21, %v772_v10 }
 0x165   :  { %v727_v11 = vpop.f32.mrf.mxu2  ;;  %v818_v13 = vmax.f32 %v773_v48, 0.0 }
 0x166   :  { %v728_v12 = vadd.f32 %v1360_v21, %v727_v11 }
 0x167   :  { %850 = vst.msk [vmem:[%s1537_s6 + $0xc8] sm:$0xff] %vm59_vm0, %v818_v13 }
 0x168   :  { %v803_v14 = vmax.f32 %v728_v12, 0.0 }
 0x16a   :  { %835 = vst.msk [vmem:[%s1537_s6 + $0x50] sm:$0xff] %vm59_vm0, %v803_v14  ;;  %v775_v15 = vpop.f32.mrf.mxu3 }
 0x16b   :  { %v776_v16 = vadd.f32 %v1360_v21, %v775_v15 }
 0x16d   :  { %v730_v17 = vpop.f32.mrf.mxu2  ;;  %v819_v19 = vmax.f32 %v776_v16, 0.0 }
 0x16e   :  { %v731_v18 = vadd.f32 %v1360_v21, %v730_v17 }
 0x16f   :  { %851 = vst.msk [vmem:[%s1537_s6 + $0xd0] sm:$0xff] %vm59_vm0, %v819_v19 }
 0x170   :  { %v804_v20 = vmax.f32 %v731_v18, 0.0 }
 0x172   :  { %836 = vst.msk [vmem:[%s1537_s6 + $0x58] sm:$0xff] %vm59_vm0, %v804_v20  ;;  %v778_v22 = vpop.f32.mrf.mxu3 }
 0x173   :  { %v779_v23 = vadd.f32 %v1360_v21, %v778_v22 }
 0x175   :  { %v733_v24 = vpop.f32.mrf.mxu2  ;;  %v820_v26 = vmax.f32 %v779_v23, 0.0 }
 0x176   :  { %v734_v25 = vadd.f32 %v1360_v21, %v733_v24 }
 0x177   :  { %852 = vst.msk [vmem:[%s1537_s6 + $0xd8] sm:$0xff] %vm59_vm0, %v820_v26 }
 0x178   :  { %v805_v27 = vmax.f32 %v734_v25, 0.0 }
 0x17a   :  { %837 = vst.msk [vmem:[%s1537_s6 + $0x60] sm:$0xff] %vm59_vm0, %v805_v27  ;;  %v781_v28 = vpop.f32.mrf.mxu3 }
 0x17b   :  { %v782_v29 = vadd.f32 %v1360_v21, %v781_v28 }
 0x17d   :  { %v736_v30 = vpop.f32.mrf.mxu2  ;;  %v821_v32 = vmax.f32 %v782_v29, 0.0 }
 0x17e   :  { %v737_v31 = vadd.f32 %v1360_v21, %v736_v30 }
 0x17f   :  { %853 = vst.msk [vmem:[%s1537_s6 + $0xe0] sm:$0xff] %vm59_vm0, %v821_v32 }
 0x180   :  { %v806_v33 = vmax.f32 %v737_v31, 0.0 }
 0x182   :  { %838 = vst.msk [vmem:[%s1537_s6 + $0x68] sm:$0xff] %vm59_vm0, %v806_v33  ;;  %v784_v34 = vpop.f32.mrf.mxu3 }
 0x183   :  { %v785_v35 = vadd.f32 %v1360_v21, %v784_v34 }
 0x185   :  { %v739_v36 = vpop.f32.mrf.mxu2  ;;  %v822_v38 = vmax.f32 %v785_v35, 0.0 }
 0x186   :  { %v740_v37 = vadd.f32 %v1360_v21, %v739_v36 }
 0x187   :  { %854 = vst.msk [vmem:[%s1537_s6 + $0xe8] sm:$0xff] %vm59_vm0, %v822_v38 }
 0x188   :  { %v807_v39 = vmax.f32 %v740_v37, 0.0 }
 0x18a   :  { %839 = vst.msk [vmem:[%s1537_s6 + $0x70] sm:$0xff] %vm59_vm0, %v807_v39  ;;  %v787_v40 = vpop.f32.mrf.mxu3 }
 0x18b   :  { %v788_v41 = vadd.f32 %v1360_v21, %v787_v40 }
 0x18d   :  { %v742_v42 = vpop.f32.mrf.mxu2  ;;  %v823_v44 = vmax.f32 %v788_v41, 0.0 }
 0x18e   :  { %v743_v43 = vadd.f32 %v1360_v21, %v742_v42 }
 0x18f   :  { %855 = vst.msk [vmem:[%s1537_s6 + $0xf0] sm:$0xff] %vm59_vm0, %v823_v44 }
 0x190   :  { %v808_v45 = vmax.f32 %v743_v43, 0.0 }
 0x192   :  { %840 = vst.msk [vmem:[%s1537_s6 + $0x78] sm:$0xff] %vm59_vm0, %v808_v45  ;;  %v790_v46 = vpop.f32.mrf.mxu3 }
 0x193   :  { %v791_v47 = vadd.f32 %v1360_v21, %v790_v46 }
 0x195   :  { %v745_v49 = vpop.f32.mrf.mxu2  ;;  %v824_v51 = vmax.f32 %v791_v47, 0.0 }
 0x196   :  { %v746_v50 = vadd.f32 %v1360_v21, %v745_v49 }
 0x197   :  { %856 = vst.msk [vmem:[%s1537_s6 + $0xf8] sm:$0xff] %vm59_vm0, %v824_v51 }
 0x198   :  { %v809_v52 = vmax.f32 %v746_v50, 0.0 }
 0x19a   :  { %841 = vst.msk [vmem:[%s1537_s6 + $0x80] sm:$0xff] %vm59_vm0, %v809_v52 }
 0x19d   :  { %v748_v53 = vpop.f32.mrf.mxu2 }
 0x19e   :  { %v749_v54 = vadd.f32 %v1360_v21, %v748_v53 }
 0x1a0   :  { %v810_v55 = vmax.f32 %v749_v54, 0.0 }
 0x1a2   :  { %842 = vst.msk [vmem:[%s1537_s6 + $0x88] sm:$0xff] %vm59_vm0, %v810_v55 }
 0x1a5   :  { %v751_v56 = vpop.f32.mrf.mxu2 }
 0x1a6   :  { %v752_v57 = vadd.f32 %v1360_v21, %v751_v56 }
 0x1a8   :  { %v811_v58 = vmax.f32 %v752_v57, 0.0 }
 0x1aa   :  { %843 = vst.msk [vmem:[%s1537_s6 + $0x90] sm:$0xff] %vm59_vm0, %v811_v58 }
 0x1ad   :  { %v754_v59 = vpop.f32.mrf.mxu2 }
 0x1ae   :  { %v755_v60 = vadd.f32 %v1360_v21, %v754_v59 }
 0x1b0   :  { %v812_v61 = vmax.f32 %v755_v60, 0.0 }
 0x1b2   :  { %844 = vst.msk [vmem:[%s1537_s6 + $0x98] sm:$0xff] %vm59_vm0, %v812_v61 }
 0x1b5   :  { %v757_v62 = vpop.f32.mrf.mxu2 }
 0x1b6   :  { %v758_v63 = vadd.f32 %v1360_v21, %v757_v62 }
 0x1b8   :  { %v813_v0 = vmax.f32 %v758_v63, 0.0 }
 0x1ba   :  { %845 = vst.msk [vmem:[%s1537_s6 + $0xa0] sm:$0xff] %vm59_vm0, %v813_v0 }
 0x1bd   :  { %v760_v1 = vpop.f32.mrf.mxu2 }
 0x1be   :  { %v761_v2 = vadd.f32 %v1360_v21, %v760_v1 }
 0x1c0   :  { %v814_v3 = vmax.f32 %v761_v2, 0.0 }
 0x1c2   :  { %846 = vst.msk [vmem:[%s1537_s6 + $0xa8] sm:$0xff] %vm59_vm0, %v814_v3 }
 0x1c5   :  { %v763_v4 = vpop.f32.mrf.mxu2 }
 0x1c6   :  { %v764_v5 = vadd.f32 %v1360_v21, %v763_v4 }
 0x1c8   :  { %v815_v6 = vmax.f32 %v764_v5, 0.0 }
 0x1ca   :  { %847 = vst.msk [vmem:[%s1537_s6 + $0xb0] sm:$0xff] %vm59_vm0, %v815_v6 }
 0x1cd   :  { %v766_v7 = vpop.f32.mrf.mxu2 }
 0x1ce   :  { %v767_v8 = vadd.f32 %v1360_v21, %v766_v7 }
 0x1d0   :  { %v816_v9 = vmax.f32 %v767_v8, 0.0 }
 0x1d2   :  { %848 = vst.msk [vmem:[%s1537_s6 + $0xb8] sm:$0xff] %vm59_vm0, %v816_v9 }
 0x1d5   :  { %v769_v10 = vpop.f32.mrf.mxu2 }
 0x1d6   :  { %v770_v48 = vadd.f32 %v1360_v21, %v769_v10 }
 0x1d8   :  { %v817_v11 = vmax.f32 %v770_v48, 0.0 }
 0x1da   :  { %849 = vst.msk [vmem:[%s1537_s6 + $0xc0] sm:$0xff] %vm59_vm0, %v817_v11 }

</bundles_post_ra>
